<compile_context>
chip_gen: v6e
topology: v6e:2x2x1
jax: 0.10.0
libtpu: 0.0.40
codegen_flags: <defaults>
</compile_context>

<pallas_src>
import jax
import jax.numpy as jnp
from jax.experimental import pallas as pl
from jax.experimental.pallas import tpu as pltpu


def _round_up(x: int, m: int) -> int:
    return ((x + m - 1) // m) * m


def _linear_kernel(h_ref, w_ref, b_ref, o_ref):
    """One (TB, C_pad) output tile: o = h @ W + b.

    h: (TB, H) f32 (cast to bf16 in-kernel), W: (H, C_pad) bf16 (resident),
    b: (1, C_pad) f32 (resident), o: (TB, C_pad) f32.
    """
    h_bf16 = h_ref[...].astype(jnp.bfloat16)           # VPU cast; no HBM pre-pass
    acc = jnp.dot(h_bf16, w_ref[...], preferred_element_type=jnp.float32)
    o_ref[...] = (acc + b_ref[...]).astype(o_ref.dtype)


def prepare_readout_weights(w, b):
    """One-time pad + cast of the static weights to the kernel layout.

    w: (H, C) f32 -> (H, C_pad) bf16;  b: (1|C,) -> (1, C_pad) f32.
    """
    H, C = w.shape
    C_pad = _round_up(C, 128)                           # lane-dense output
    w_p = jnp.pad(w, ((0, 0), (0, C_pad - C))).astype(jnp.bfloat16)
    b_p = jnp.pad(jnp.reshape(b, (1, C)).astype(jnp.float32),
                  ((0, 0), (0, C_pad - C)))
    return w_p, b_p


def _choose_tb(B: int, tb_max: int) -> int:
    """Balanced batch tile: >=2 tiles for large B (v7x megacore), <8 rows waste."""
    if B <= 16:
        return B                                        # single full-dim tile
    n_tiles = max(2, pl.cdiv(B, tb_max))                # both v7x TCs get work
    tb = _round_up(pl.cdiv(B, n_tiles), 8)              # sublane alignment
    return min(tb, _round_up(B, 8))


def linear_pallas(h, w_padded, b_padded, n_classes, *, tb_max: int = 1024):
    """h: (B, H) f32; w_padded: (H, C_pad) bf16; b_padded: (1, C_pad) f32.

    Returns (B, n_classes) f32 logits = h @ W + b, computed on the MXU.
    """
    B, H = h.shape
    Hw, C_pad = w_padded.shape
    assert H == Hw and C_pad % 128 == 0 and n_classes <= C_pad

    # Cap TB so double-buffered h + out tiles (plus resident W) stay well
    # inside the 32 MiB scoped VMEM that v7x also honours.
    bytes_per_row = h.dtype.itemsize * H + 4 * C_pad
    budget = 20 * 1024 * 1024
    vmem_cap = max(8, (budget // (2 * bytes_per_row)) // 8 * 8)
    TB = _choose_tb(B, min(tb_max, vmem_cap))
    grid = (pl.cdiv(B, TB),)

    # TODO(synk): if an xprof trace shows exposed DMA, add
    # pipeline_mode=pl.Buffered(3) on the h BlockSpec.
    out_padded = pl.pallas_call(
        _linear_kernel,
        out_shape=jax.ShapeDtypeStruct((B, C_pad), jnp.float32),
        grid=grid,
        in_specs=[
            pl.BlockSpec((TB, H), lambda i: (i, 0)),      # h tile (streamed)
            pl.BlockSpec((H, C_pad), lambda i: (0, 0)),   # W (VMEM-resident)
            pl.BlockSpec((1, C_pad), lambda i: (0, 0)),   # bias (resident)
        ],
        out_specs=pl.BlockSpec((TB, C_pad), lambda i: (i, 0)),
        compiler_params=pltpu.CompilerParams(
            dimension_semantics=("parallel",),
            vmem_limit_bytes=32 * 1024 * 1024,
        ),
    )(h, w_padded, b_padded)

    # Only the cheap column slice remains; batch is unpadded.
    return out_padded[:, :n_classes]


# Below this many bytes of operand traffic, a custom-call launch + one grid
# step costs more than the whole problem; let XLA's fused dot handle it.
_PALLAS_MIN_BYTES = 256 * 1024


def readout_linear(h, w, b, w_padded, b_padded, n_classes, *, force_pallas=False):
    if not force_pallas:
        work_bytes = (h.size * h.dtype.itemsize
                      + w.size * w.dtype.itemsize
                      + h.shape[0] * n_classes * 4)
        if work_bytes < _PALLAS_MIN_BYTES:
            return h @ w + jnp.reshape(b, (1, -1))
    return linear_pallas(h, w_padded, b_padded, n_classes)


class ReadoutModule:
    """JAX/Pallas port of the PyTorch ReadoutModule."""

    def __init__(self, h_dims, n_classes, key):
        kw, kb = jax.random.split(key)
        # nn.Linear-style uniform(-1/sqrt(fan_in), 1/sqrt(fan_in)) init.
        bound = 1.0 / jnp.sqrt(jnp.float32(h_dims))
        # Weight stored transposed: (h_dims, n_classes) so forward is h @ W.
        self.w = jax.random.uniform(
            kw, (h_dims, n_classes), jnp.float32, minval=-bound, maxval=bound
        )
        self.b = jax.random.uniform(
            kb, (1, n_classes), jnp.float32, minval=-bound, maxval=bound
        )
        self.n_classes = n_classes
        # One-time pad + cast of the static weights to the kernel layout.
        self.w_padded, self.b_padded = prepare_readout_weights(self.w, self.b)

    def __call__(self, nodes_state, edge_states, pretrain=False, force_pallas=False):
        if pretrain:
            assert len(nodes_state) == 1
            h = nodes_state[0]["h"]                       # (batch, h_dims)
            y = readout_linear(h, self.w, self.b, self.w_padded, self.b_padded,
                               self.n_classes, force_pallas=force_pallas)
        else:
            # Pure indexing / broadcast; no kernel needed.
            y = nodes_state[0]["y"][:, None]
        return y


if __name__ == "__main__":
    key = jax.random.PRNGKey(0)
    k_h, k_y, k_mod, k_h2, k_w2, k_b2 = jax.random.split(key, 6)

    # --- Module-sized (small) shapes --------------------------------------
    batch, h_dims, n_classes = 2, 32, 8
    h = jax.random.normal(k_h, (batch, h_dims), jnp.float32)
    y_raw = jax.random.normal(k_y, (batch, n_classes), jnp.float32)
    nodes_state = [{"h": h, "y": y_raw}]
    edge_states = []

    module = ReadoutModule(h_dims=h_dims, n_classes=n_classes, key=k_mod)
    ref_small = h @ module.w + module.b

    # pretrain=True at tiny shapes: falls back to XLA's fused dot.
    logits = jax.block_until_ready(module(nodes_state, edge_states, pretrain=True))
    assert logits.shape == (batch, n_classes)
    assert jnp.allclose(logits, ref_small, atol=1e-5, rtol=1e-5)

    # Same tiny shapes, forced through the Pallas kernel (single full-dim
    # batch tile, resident bf16 W, lane-dense C_pad=128 output).
    logits_p = jax.block_until_ready(
        module(nodes_state, edge_states, pretrain=True, force_pallas=True)
    )
    assert logits_p.shape == (batch, n_classes)
    assert jnp.allclose(logits_p, ref_small, atol=2e-2, rtol=2e-2)

    # --- Larger shapes: balanced batch tiles + ragged last tile -----------
    B2, H2, C2 = 600, 800, 10          # non-multiples of tile sizes everywhere
    h2 = jax.random.normal(k_h2, (B2, H2), jnp.float32)
    bound2 = 1.0 / jnp.sqrt(jnp.float32(H2))
    w2 = jax.random.uniform(k_w2, (H2, C2), jnp.float32, minval=-bound2, maxval=bound2)
    b2 = jax.random.uniform(k_b2, (1, C2), jnp.float32, minval=-bound2, maxval=bound2)
    w2_p, b2_p = prepare_readout_weights(w2, b2)      # one-time weight prep

    out2 = jax.block_until_ready(linear_pallas(h2, w2_p, b2_p, C2))
    assert out2.shape == (B2, C2)
    ref2 = h2 @ w2 + b2
    assert jnp.allclose(out2, ref2, atol=2e-2, rtol=2e-2)

    # pretrain=False path: indexing only (no kernel).
    y2 = jax.block_until_ready(module(nodes_state, edge_states, pretrain=False))
    assert y2.shape == (batch, 1, n_classes)

    print("KERNEL_OK")
</pallas_src>

<mosaic_0001>
module attributes {stable_mosaic.version = 11 : i64} {
  func.func @_linear_kernel(%arg0: i32, %arg1: memref<2x32xf32, #tpu.memory_space<vmem>>, %arg2: memref<32x128xbf16, #tpu.memory_space<vmem>>, %arg3: memref<1x128xf32, #tpu.memory_space<vmem>>, %arg4: memref<2x128xf32, #tpu.memory_space<vmem>>) attributes {dimension_semantics = [#tpu.dimension_semantics<parallel>], iteration_bounds = array<i64: 1>, scalar_prefetch = 0 : i64, scratch_operands = 0 : i64, tpu.core_type = #tpu.core_type<tc>, window_params = [{transform_indices = @transform_0, window_bounds = array<i64: 2, 32>}, {pipeline_mode = #tpu.pipeline_mode<synchronous>, transform_indices = @transform_1, window_bounds = array<i64: 32, 128>}, {pipeline_mode = #tpu.pipeline_mode<synchronous>, transform_indices = @transform_2, window_bounds = array<i64: 1, 128>}, {transform_indices = @transform_3, window_bounds = array<i64: 2, 128>}]} {
    %c0 = arith.constant 0 : index
    %c0_0 = arith.constant 0 : index
    %0 = vector.load %arg1[%c0, %c0_0] : memref<2x32xf32, #tpu.memory_space<vmem>>, vector<2x32xf32>
    %1 = arith.truncf %0 : vector<2x32xf32> to vector<2x32xbf16>
    %c0_1 = arith.constant 0 : index
    %c0_2 = arith.constant 0 : index
    %2 = vector.load %arg2[%c0_1, %c0_2] : memref<32x128xbf16, #tpu.memory_space<vmem>>, vector<32x128xbf16>
    %cst = arith.constant dense<0.000000e+00> : vector<2x128xf32>
    %3 = tpu.matmul %1, %2, %cst {dimension_numbers = #tpu.dot_dimension_numbers<[1], [0], [0], [1], [0, 0, 1, 1], [], []>} : vector<2x32xbf16>, vector<32x128xbf16>, vector<2x128xf32> -> vector<2x128xf32>
    %c0_3 = arith.constant 0 : index
    %c0_4 = arith.constant 0 : index
    %4 = vector.load %arg3[%c0_3, %c0_4] : memref<1x128xf32, #tpu.memory_space<vmem>>, vector<1x128xf32>
    %5 = vector.broadcast %4 : vector<1x128xf32> to vector<2x128xf32>
    %6 = arith.addf %3, %5 : vector<2x128xf32>
    %c0_5 = arith.constant 0 : index
    %c0_6 = arith.constant 0 : index
    %7 = vector.load %arg4[%c0_5, %c0_6] : memref<2x128xf32, #tpu.memory_space<vmem>>, vector<2x128xf32>
    tpu.vector_store %arg4[%c0_5, %c0_6], %6 {strides = array<i32>} : memref<2x128xf32, #tpu.memory_space<vmem>>, vector<2x128xf32>,
    return
  }
  func.func @transform_0(%arg0: i32) -> (i32, i32) {
    %c0_i32 = arith.constant 0 : i32
    %c0_i32_0 = arith.constant 0 : i32
    return %arg0, %c0_i32 : i32, i32
  }
  func.func @transform_1(%arg0: i32) -> (i32, i32) {
    %c0_i32 = arith.constant 0 : i32
    %c0_i32_0 = arith.constant 0 : i32
    %c0_i32_1 = arith.constant 0 : i32
    return %c0_i32, %c0_i32_0 : i32, i32
  }
  func.func @transform_2(%arg0: i32) -> (i32, i32) {
    %c0_i32 = arith.constant 0 : i32
    %c0_i32_0 = arith.constant 0 : i32
    %c0_i32_1 = arith.constant 0 : i32
    return %c0_i32, %c0_i32_0 : i32, i32
  }
  func.func @transform_3(%arg0: i32) -> (i32, i32) {
    %c0_i32 = arith.constant 0 : i32
    %c0_i32_0 = arith.constant 0 : i32
    return %arg0, %c0_i32 : i32, i32
  }
}

</mosaic_0001>

<bundles_post_ra>
// kernel: tpu_custom_call.1
= control target key start
LH: loop header
LB: loop body
LE: loop exit
PB: predicated region body
PF: predicated region fallthrough
CT: control target
= control target key end

     0   :  { %8 = vsyncpa [#allocation3], 0  ;;  %s257_s0 = inlined_call_operand.hbm [shape: f32[2,32], index: 0, kind: input, shape index: {}]   ;;  %s258_s1 = inlined_call_operand.hbm [shape: bf16[32,128], index: 1, kind: input, shape index: {}]   ;;  %s259_s2 = inlined_call_operand.vmem [shape: f32[1,128], index: 2, kind: input, shape index: {}]   ;;  %s260_s3 = inlined_call_operand.hbm [shape: f32[2,128], index: 3, kind: output, shape index: {}]  }
   0x1   :  { %9 = vsyncpa [#allocation6], 0 }
   0x2   :  { %10 = vsyncpa [#allocation4], 0  ;;  %s218_s12 = smov [#allocation2]   ;;  %s219_s14 = smov [#allocation5]  }
   0x3   :  { %s17_s13 = sshll.u32 %s218_s12, 4  ;;  %s26_s15 = sshll.u32 %s219_s14, 4  ;;  %s18_s13 = int_to_ptr.vmem [resolvable:$true] %s17_s13  ;;  %s27_s15 = int_to_ptr.vmem [resolvable:$true] %s26_s15 }
   0x4   :  { %s160_s16 = scalar_lea.vmem %s18_s13, 32  ;;  %p165_p1 = scmp.lt.s32.totalorder %s18_s13, %s18_s13 }
   0x5   :  { %p161_p0 = scmp.ne.s32.totalorder %s18_s13, %s160_s16  ;;  %p166_p2 = scmp.lt.s32.totalorder %s160_s16, %s160_s16 }
   0x7   :  { %p167_p3 = por %p166_p2, %p165_p1 }
   0x9   :  { %p168_p4 = pnand %p167_p3, %p161_p0 }
   0xb   :  { %171 = shalt.err (!%p168_p4)
}
   0xc   :  { %20 = dma.hbm_to_vmem [thread:$0]  %s257_s0, 32, %s18_s13, [#allocation3]  }
   0xd   :  { %s180_s19 = scalar_lea.vmem %s27_s15, 256  ;;  %p185_p6 = scmp.lt.s32.totalorder %s27_s15, %s27_s15 }
   0xe   :  { %p181_p5 = scmp.ne.s32.totalorder %s27_s15, %s180_s19  ;;  %p186_p7 = scmp.lt.s32.totalorder %s180_s19, %s180_s19 }
  0x10   :  { %p187_p8 = por %p186_p7, %p185_p6 }
  0x12   :  { %p188_p9 = pnand %p187_p8, %p181_p5 }
  0x14   :  { %191 = shalt.err (!%p188_p9)
}
  0x15   :  { %s220_s20 = smov 64   ;;  %s221_s21 = smov 4  }
  0x16   :  { %32 = dma.hbm_to_vmem [thread:$0]  %s258_s1, 256, %s27_s15, [#allocation6], %s220_s20, %s220_s20, %s221_s21  }
  0x17   :  { %212 = dma.done.wait [#allocation3], 32  }
  0x18   :  { %213 = vsyncadd [#allocation3], 4294967264 }
  0x19   :  { %214 = dma.done.wait [#allocation6], 256  }
  0x1a   :  { %215 = vsyncadd [#allocation6], 4294967040  ;;  %v222_v0 = vmov 0.0   ;;  %vm223_vm0 = vmmov 0   ;;  %v150_v1 = vld [vmem:[#allocation5 + $0x8] sm:$0xff]   ;;  %v151_v2 = vld [vmem:[#allocation5] sm:$0xff]  }
  0x1b   :  { %135 = vmatprep.subr.bf16.mxu0 %v222_v0  ;;  %139 = vmatprep.mubr.msk.bf16.mxu0 %vm223_vm0, %v222_v0  ;;  %v42_v3 = vld [vmem:[#allocation2] sm:$0x3]  ;;  %vm67_vm1 = vcmask 261120   ;;  %s224_s1 = smov [#allocation7]  }
  0x1c   :  { %136 = vmatpush3.bf16.msra.mxu0 %v150_v1  ;;  %v43_v4 = vpack.c.bf16 %v42_v3, %v42_v3  ;;  %v128_v5 = vld [vmem:[%s259_s2] ss:$0 sm:$0xff]  ;;  %s118_s25 = sshll.u32 %s224_s1, 4  ;;  %s119_s25 = int_to_ptr.vmem [resolvable:$true] %s118_s25 }
  0x1d   :  { %137 = vmatprep.subr.bf16.mxu0 %v222_v0  ;;  %s192_s26 = scalar_lea.vmem %s119_s25, 32  ;;  %p197_p11 = scmp.lt.s32.totalorder %s119_s25, %s119_s25 }
  0x1e   :  { %p193_p10 = scmp.ne.s32.totalorder %s119_s25, %s192_s26  ;;  %p198_p12 = scmp.lt.s32.totalorder %s192_s26, %s192_s26 }
  0x20   :  { %138 = vmatpush3.bf16.msra.mxu0 %v151_v2  ;;  %p199_p13 = por %p198_p12, %p197_p11 }
  0x22   :  { %p200_p0 = pnand %p199_p13, %p193_p10 }
  0x23   :  { %140 = vmatmul.mubr.msk.bf16.vlgmr.msra.gmra.mxu0 %vm67_vm1, %v43_v4 }
  0xe3   :  { %v105_v6 = vpop.f32.mrf.mxu0 }
  0xe4   :  { %v106_v7 = vadd.f32 %v128_v5, %v105_v6 }
  0xe5   :  { %v141_v8 = vpop.f32.mrf.mxu0 }
  0xe6   :  { %111 = vst [vmem:[#allocation7] sm:$0x3] %v106_v7 }
  0xe7   :  { %v108_v9 = vpop.f32.mrf.mxu0 }
  0xe8   :  { %203 = shalt.err (!%p200_p0)
}
  0xe9   :  { %121 = dma.vmem_to_hbm [thread:$0]  %s119_s25, 32, %s260_s3, [#allocation4]   ;;  %v142_v10 = vpop.f32.mrf.mxu0 }
  0xea   :  { %216 = dma.done.wait [#allocation4], 32  }
  0xeb   :  { %217 = vsyncadd [#allocation4], 4294967264 }
  0xec   :  { %125 = vsyncpa [#allocation3], 1 }
  0xed   :  { %126 = vsyncpa [#allocation6], 1 }
  0xee   :  { %127 = vsyncpa [#allocation4], 1 }

</bundles_post_ra>
